<compile_context>
chip_gen: v7x
topology: tpu7x:2x2x1
jax: 0.10.0
libtpu: 0.0.40
codegen_flags: <defaults>
</compile_context>

<pallas_src>
import functools

import jax
import jax.numpy as jnp
from jax.experimental import pallas as pl
from jax.experimental.pallas import tpu as pltpu


def _round_up(x, m):
    return (x + m - 1) // m * m


# ----------------------------------------------------------------------------
# Pallas kernel: one (tm, tt) output tile of the decoder outer-sum
# ----------------------------------------------------------------------------
def _linear_decoder_kernel(x1_ref, x2t_ref, w1_ref, w2_ref, c_ref, o_ref, *, act):
    # s1[n] = input1[n] . w1        (lane reduce over the padded feature dim)
    x1 = x1_ref[...].astype(jnp.float32)                    # (tm, Dp)
    w1 = w1_ref[...].astype(jnp.float32)                    # (1,  Dp)
    s1 = jnp.sum(x1 * w1, axis=1, keepdims=True)            # (tm, 1)

    # s2[t] = input2[t] . w2        (sublane reduce; T already on the lane dim)
    x2t = x2t_ref[...].astype(jnp.float32)                  # (Dp, tt)
    w2 = w2_ref[...].astype(jnp.float32)                    # (Dp, 1)
    s2 = jnp.sum(x2t * w2, axis=0, keepdims=True)           # (1,  tt)

    out = s1 + s2 + c_ref[...].astype(jnp.float32)          # (tm, tt)
    if act is not None:
        out = act(out)                                       # fused epilogue
    o_ref[...] = out.astype(o_ref.dtype)


# ----------------------------------------------------------------------------
# One-time parameter packing (hoisted out of the per-call path)
# ----------------------------------------------------------------------------
def pack_linear_decoder_params(weight, bias, *, input_dim, issymmetric=True):
    """Pack the nn.Linear(D or 2D -> 1) params into padded kernel layout."""
    D = int(input_dim)
    w = jnp.asarray(weight, jnp.float32).reshape(-1)
    if issymmetric:
        assert w.shape[0] == D
        w1, w2 = w, w
        bias_mult = 2.0          # bias is applied by BOTH self.layer() calls
    else:
        assert w.shape[0] == 2 * D
        w1, w2 = w[:D], w[D:]
        bias_mult = 1.0
    if bias is None:
        c = jnp.zeros((), jnp.float32)
    else:
        c = jnp.asarray(bias, jnp.float32).reshape(())
    Dp = _round_up(D, 128)
    return {
        "w1row": jnp.pad(w1, (0, Dp - D)).reshape(1, Dp),
        "w2col": jnp.pad(w2, (0, Dp - D)).reshape(Dp, 1),
        "c": (bias_mult * c).reshape(1, 1),
    }


def _fit_tiles(tm, tt, Dp, in_b, out_b, budget):
    """Shrink (tm, tt) until the double-buffered blocks fit the VMEM budget."""
    def need(a, b):
        return 2 * (a * Dp * in_b + Dp * b * in_b + a * b * out_b)

    while need(tm, tt) > budget and tm > 8:
        new = _round_up(max(tm // 2, 8), 8)
        if new >= tm:
            break
        tm = new
    while need(tm, tt) > budget and tt > 128:
        new = _round_up(max(tt // 2, 128), 128)
        if new >= tt:
            break
        tt = new
    return tm, tt


# ----------------------------------------------------------------------------
# Forward wrapper == LinearDecoder.forward
# ----------------------------------------------------------------------------
def linear_decoder_forward(packed, input1, input2, type_index=None, *,
                           act=None, tm=512, tt=None, out_dtype=None,
                           vmem_budget=24 * 1024 * 1024):
    """input1: (N, D) embeddings; input2: (T, D) rows iterated by the PyTorch
    forward.  Returns act(scores) of shape (N, T)."""
    del type_index                       # unused by the reference forward
    N, D = input1.shape
    T, D2 = input2.shape
    assert D == D2, "input1/input2 feature dims must match"
    w1row, w2col, c = packed["w1row"], packed["w2col"], packed["c"]
    Dp = w1row.shape[1]
    assert Dp == _round_up(D, 128), "packed params built for a different input_dim"
    out_dtype = out_dtype or input1.dtype

    in_b = jnp.dtype(input1.dtype).itemsize
    out_b = jnp.dtype(out_dtype).itemsize
    Nr = _round_up(N, 8)
    Tr = _round_up(T, 128)

    # Row tile: as large as the (padded) problem allows, capped by the request.
    tm = min(_round_up(tm, 8), Nr)
    # Type tile: default to covering ALL of T in one lane tile when it fits the
    # budget (grid_j == 1 -> input2^T fetched exactly once); else 1024 lanes.
    if tt is None:
        full_need = 2 * (tm * Dp * in_b + Dp * Tr * in_b + tm * Tr * out_b)
        tt = Tr if full_need <= vmem_budget else min(1024, Tr)
    tt = min(_round_up(tt, 128), Tr)
    tm, tt = _fit_tiles(tm, tt, Dp, in_b, out_b, vmem_budget)

    Np, Tp = _round_up(N, tm), _round_up(T, tt)

    # Zero-pad to tile boundaries (exact: padded features contribute 0 to the
    # dot products; padded rows/cols are sliced off below; the pads/slice are
    # elided by XLA when the shapes are already tile-aligned).
    x1p = jnp.pad(input1, ((0, Np - N), (0, Dp - D)))
    x2tp = jnp.pad(input2.T, ((0, Dp - D), (0, Tp - T)))   # T on the lane dim

    grid = (Np // tm, Tp // tt)
    flops = int(3 * Np * Dp * grid[1] + 3 * Dp * Tp * grid[0] + 2 * Np * Tp)
    bytes_accessed = int(Np * Dp * in_b + grid[0] * Dp * Tp * in_b
                         + (2 * Dp + 1) * 4 + Np * Tp * out_b)

    out = pl.pallas_call(
        functools.partial(_linear_decoder_kernel, act=act),
        out_shape=jax.ShapeDtypeStruct((Np, Tp), out_dtype),
        grid_spec=pltpu.PrefetchScalarGridSpec(
            num_scalar_prefetch=0,
            grid=grid,
            in_specs=[
                pl.BlockSpec((tm, Dp), lambda i, j: (i, 0)),   # input1 tile
                pl.BlockSpec((Dp, tt), lambda i, j: (0, j)),   # input2^T tile
                pl.BlockSpec((1, Dp), lambda i, j: (0, 0)),    # w1 (row)
                pl.BlockSpec((Dp, 1), lambda i, j: (0, 0)),    # w2 (col)
                pl.BlockSpec((1, 1), lambda i, j: (0, 0)),     # folded bias
            ],
            out_specs=pl.BlockSpec((tm, tt), lambda i, j: (i, j)),
        ),
        compiler_params=pltpu.CompilerParams(
            dimension_semantics=("parallel", "parallel"),
            vmem_limit_bytes=int(vmem_budget + (8 << 20))),
        cost_estimate=pl.CostEstimate(
            flops=flops, transcendentals=0, bytes_accessed=bytes_accessed),
    )(x1p, x2tp, w1row, w2col, c)
    return out[:N, :T]


# ----------------------------------------------------------------------------
# Pure-JAX transcription of the PyTorch forward (for verification)
# ----------------------------------------------------------------------------
def linear_decoder_reference(weight, bias, input1, input2, *, issymmetric=True,
                             act=lambda x: x):
    w = jnp.asarray(weight, jnp.float32).reshape(-1)
    b = (jnp.zeros((), jnp.float32) if bias is None
         else jnp.asarray(bias, jnp.float32).reshape(()))
    outs = []
    for i in range(input2.shape[0]):
        xi = jnp.broadcast_to(input2[i][None, :], input1.shape)
        if issymmetric:
            o = (input1 @ w + b) + (xi @ w + b)
        else:
            o = jnp.concatenate([input1, xi], axis=1) @ w + b
        outs.append(o[:, None])
    return act(jnp.concatenate(outs, axis=1))


if __name__ == "__main__":
    key = jax.random.PRNGKey(0)
    k1, k2, k3, k4, k5 = jax.random.split(key, 5)

    # Small shapes implied by the module: N nodes, T rows iterated in input2,
    # feature dim D.
    N, T, D = 8, 4, 32
    input1 = jax.random.normal(k1, (N, D), jnp.float32)
    input2 = jax.random.normal(k2, (T, D), jnp.float32)
    type_index = jnp.arange(T, dtype=jnp.int32)   # unused by forward (API parity)

    fwd = jax.jit(functools.partial(linear_decoder_forward, act=None))

    # --- symmetric decoder: nn.Linear(D, 1, bias=True) ----------------------
    w_sym = jax.random.normal(k3, (1, D), jnp.float32) / jnp.sqrt(D)
    b_sym = 0.1 * jax.random.normal(k4, (1,), jnp.float32)
    packed_sym = pack_linear_decoder_params(w_sym, b_sym, input_dim=D,
                                            issymmetric=True)
    y_sym = jax.block_until_ready(fwd(packed_sym, input1, input2, type_index))
    ref_sym = linear_decoder_reference(w_sym, b_sym, input1, input2,
                                       issymmetric=True)
    assert y_sym.shape == (N, T)
    assert jnp.allclose(y_sym, ref_sym, rtol=1e-4, atol=1e-4)

    # --- asymmetric decoder: nn.Linear(2D, 1, bias=True) --------------------
    w_asym = jax.random.normal(k5, (1, 2 * D), jnp.float32) / jnp.sqrt(2 * D)
    packed_asym = pack_linear_decoder_params(w_asym, b_sym, input_dim=D,
                                             issymmetric=False)
    y_asym = jax.block_until_ready(fwd(packed_asym, input1, input2, type_index))
    ref_asym = linear_decoder_reference(w_asym, b_sym, input1, input2,
                                        issymmetric=False)
    assert y_asym.shape == (N, T)
    assert jnp.allclose(y_asym, ref_asym, rtol=1e-4, atol=1e-4)

    # --- fused activation + multi-tile grid on non-aligned shapes -----------
    N2, T2, D2 = 300, 200, 48
    ka, kb = jax.random.split(k5)
    x1 = jax.random.normal(ka, (N2, D2), jnp.float32)
    x2 = jax.random.normal(kb, (T2, D2), jnp.float32)
    w2_sym = jax.random.normal(k3, (1, D2), jnp.float32) / jnp.sqrt(D2)
    packed2 = pack_linear_decoder_params(w2_sym, b_sym, input_dim=D2,
                                         issymmetric=True)
    fwd_sig = jax.jit(functools.partial(linear_decoder_forward,
                                        act=jax.nn.sigmoid, tm=128, tt=128))
    y2 = jax.block_until_ready(fwd_sig(packed2, x1, x2, None))
    wv = w2_sym.reshape(-1)
    bv = b_sym.reshape(())
    ref2 = jax.nn.sigmoid((x1 @ wv + bv)[:, None] + (x2 @ wv + bv)[None, :])
    assert y2.shape == (N2, T2)
    assert jnp.allclose(y2, ref2, rtol=1e-4, atol=1e-4)

    print("KERNEL_OK")
</pallas_src>

<mosaic_0001>
module attributes {stable_mosaic.version = 11 : i64} {
  func.func @_linear_decoder_kernel(%arg0: i32, %arg1: i32, %arg2: memref<8x128xf32, #tpu.memory_space<vmem>>, %arg3: memref<128x128xf32, #tpu.memory_space<vmem>>, %arg4: memref<1x128xf32, #tpu.memory_space<vmem>>, %arg5: memref<128x1xf32, #tpu.memory_space<vmem>>, %arg6: memref<1x1xf32, #tpu.memory_space<vmem>>, %arg7: memref<8x128xf32, #tpu.memory_space<vmem>>) attributes {dimension_semantics = [#tpu.dimension_semantics<parallel>, #tpu.dimension_semantics<parallel>], iteration_bounds = array<i64: 1, 1>, scalar_prefetch = 0 : i64, scratch_operands = 0 : i64, tpu.core_type = #tpu.core_type<tc>, window_params = [{transform_indices = @transform_0, window_bounds = array<i64: 8, 128>}, {transform_indices = @transform_1, window_bounds = array<i64: 128, 128>}, {pipeline_mode = #tpu.pipeline_mode<synchronous>, transform_indices = @transform_2, window_bounds = array<i64: 1, 128>}, {pipeline_mode = #tpu.pipeline_mode<synchronous>, transform_indices = @transform_3, window_bounds = array<i64: 128, 1>}, {pipeline_mode = #tpu.pipeline_mode<synchronous>, transform_indices = @transform_4, window_bounds = array<i64: 1, 1>}, {transform_indices = @transform_5, window_bounds = array<i64: 8, 128>}]} {
    %c0 = arith.constant 0 : index
    %c0_0 = arith.constant 0 : index
    %0 = vector.load %arg2[%c0, %c0_0] : memref<8x128xf32, #tpu.memory_space<vmem>>, vector<8x128xf32>
    %c0_1 = arith.constant 0 : index
    %c0_2 = arith.constant 0 : index
    %1 = vector.load %arg4[%c0_1, %c0_2] : memref<1x128xf32, #tpu.memory_space<vmem>>, vector<1x128xf32>
    %2 = vector.broadcast %1 : vector<1x128xf32> to vector<8x128xf32>
    %3 = arith.mulf %0, %2 : vector<8x128xf32>
    %cst = arith.constant dense<0.000000e+00> : vector<8xf32>
    %4 = vector.multi_reduction <add>, %3, %cst [1] : vector<8x128xf32> to vector<8xf32>
    %5 = vector.shape_cast %4 : vector<8xf32> to vector<8x1xf32>
    %c0_3 = arith.constant 0 : index
    %c0_4 = arith.constant 0 : index
    %6 = vector.load %arg3[%c0_3, %c0_4] : memref<128x128xf32, #tpu.memory_space<vmem>>, vector<128x128xf32>
    %c0_5 = arith.constant 0 : index
    %c0_6 = arith.constant 0 : index
    %7 = vector.load %arg5[%c0_5, %c0_6] : memref<128x1xf32, #tpu.memory_space<vmem>>, vector<128x1xf32>
    %8 = vector.broadcast %7 : vector<128x1xf32> to vector<128x128xf32>
    %9 = arith.mulf %6, %8 : vector<128x128xf32>
    %cst_7 = arith.constant dense<0.000000e+00> : vector<128xf32>
    %10 = vector.multi_reduction <add>, %9, %cst_7 [0] : vector<128x128xf32> to vector<128xf32>
    %11 = vector.shape_cast %10 : vector<128xf32> to vector<1x128xf32>
    %12 = vector.broadcast %5 : vector<8x1xf32> to vector<8x128xf32>
    %13 = vector.broadcast %11 : vector<1x128xf32> to vector<8x128xf32>
    %14 = arith.addf %12, %13 : vector<8x128xf32>
    %c0_8 = arith.constant 0 : index
    %c0_9 = arith.constant 0 : index
    %15 = vector.load %arg6[%c0_8, %c0_9] : memref<1x1xf32, #tpu.memory_space<vmem>>, vector<1x1xf32>
    %16 = vector.broadcast %15 : vector<1x1xf32> to vector<8x128xf32>
    %17 = arith.addf %14, %16 : vector<8x128xf32>
    %c0_10 = arith.constant 0 : index
    %c0_11 = arith.constant 0 : index
    %18 = vector.load %arg7[%c0_10, %c0_11] : memref<8x128xf32, #tpu.memory_space<vmem>>, vector<8x128xf32>
    tpu.vector_store %arg7[%c0_10, %c0_11], %17 {strides = array<i32>} : memref<8x128xf32, #tpu.memory_space<vmem>>, vector<8x128xf32>,
    return
  }
  func.func @transform_0(%arg0: i32, %arg1: i32) -> (i32, i32) {
    %c0_i32 = arith.constant 0 : i32
    %c0_i32_0 = arith.constant 0 : i32
    return %arg0, %c0_i32 : i32, i32
  }
  func.func @transform_1(%arg0: i32, %arg1: i32) -> (i32, i32) {
    %c0_i32 = arith.constant 0 : i32
    %c0_i32_0 = arith.constant 0 : i32
    return %c0_i32, %arg1 : i32, i32
  }
  func.func @transform_2(%arg0: i32, %arg1: i32) -> (i32, i32) {
    %c0_i32 = arith.constant 0 : i32
    %c0_i32_0 = arith.constant 0 : i32
    %c0_i32_1 = arith.constant 0 : i32
    return %c0_i32, %c0_i32_0 : i32, i32
  }
  func.func @transform_3(%arg0: i32, %arg1: i32) -> (i32, i32) {
    %c0_i32 = arith.constant 0 : i32
    %c0_i32_0 = arith.constant 0 : i32
    %c0_i32_1 = arith.constant 0 : i32
    return %c0_i32, %c0_i32_0 : i32, i32
  }
  func.func @transform_4(%arg0: i32, %arg1: i32) -> (i32, i32) {
    %c0_i32 = arith.constant 0 : i32
    %c0_i32_0 = arith.constant 0 : i32
    %c0_i32_1 = arith.constant 0 : i32
    return %c0_i32, %c0_i32_0 : i32, i32
  }
  func.func @transform_5(%arg0: i32, %arg1: i32) -> (i32, i32) {
    %c0_i32 = arith.constant 0 : i32
    return %arg0, %arg1 : i32, i32
  }
}

</mosaic_0001>

<bundles_post_ra>
// kernel: linear_decoder_forward.1
= control target key start
LH: loop header
LB: loop body
LE: loop exit
PB: predicated region body
PF: predicated region fallthrough
CT: control target
= control target key end

     0   :  { %v204_v0 = vmov 0   ;;  %s343_s3 = inlined_call_operand.vmem [shape: f32[128,1], index: 3, kind: input, shape index: {}]   ;;  %s344_s4 = inlined_call_operand.<no memory space> [shape: f32[1,1], index: 4, kind: input, shape index: {}]   ;;  %s345_s0 = inlined_call_operand.vmem [shape: f32[8,128], index: 0, kind: input, shape index: {}]   ;;  %s346_s2 = inlined_call_operand.vmem [shape: f32[1,128], index: 2, kind: input, shape index: {}]   ;;  %s347_s1 = inlined_call_operand.vmem [shape: f32[128,128], index: 1, kind: input, shape index: {}]   ;;  %s348_s5 = inlined_call_operand.vmem [shape: f32[8,128], index: 5, kind: output, shape index: {}]  }
   0x1   :  { %203 = vset.pattern.permute.xlu1 %v204_v0  ;;  %202 = vset.pattern.permute.xlu0 %v204_v0  ;;  %v51_v1 = vld [vmem:[%s343_s3 + $0x10] sm:$0xff]  ;;  %v49_v2 = vld [vmem:[%s343_s3] sm:$0xff]  ;;  %v10_v3 = vstv %s344_s4  ;;  %v52_v4 = vld [vmem:[%s343_s3 + $0x18] sm:$0xff] }
   0x2   :  { %77 = vperm.xlu1 %203, %v51_v1   ;;  %67 = vperm.xlu0 %202, %v49_v2   ;;  %11 = vst [vmem:[#allocation2] sm:$0x1] %v10_v3  ;;  %v50_v5 = vld [vmem:[%s343_s3 + $0x8] sm:$0xff]  ;;  %v53_v7 = vld [vmem:[%s343_s3 + $0x20] sm:$0xff]  ;;  %v56_v8 = vld [vmem:[%s343_s3 + $0x38] sm:$0xff] }
   0x3   :  { %v54_v6 = vld [vmem:[%s343_s3 + $0x28] sm:$0xff]  ;;  %v55_v9 = vld [vmem:[%s343_s3 + $0x30] sm:$0xff]  ;;  %v57_v11 = vld [vmem:[%s343_s3 + $0x40] sm:$0xff] }
   0x4   :  { %v58_v10 = vld [vmem:[%s343_s3 + $0x48] sm:$0xff]  ;;  %v60_v12 = vld [vmem:[%s343_s3 + $0x58] sm:$0xff]  ;;  %v59_v13 = vld [vmem:[%s343_s3 + $0x50] sm:$0xff] }
   0x5   :  { %v62_v14 = vld [vmem:[%s343_s3 + $0x68] sm:$0xff]  ;;  %v61_v15 = vld [vmem:[%s343_s3 + $0x60] sm:$0xff]  ;;  %v64_v16 = vld [vmem:[%s343_s3 + $0x78] sm:$0xff] }
   0x6   :  { %82 = vperm.xlu1 %203, %v52_v4   ;;  %72 = vperm.xlu0 %202, %v50_v5   ;;  %v63_v17 = vld [vmem:[%s343_s3 + $0x70] sm:$0xff]  ;;  %v22_v19 = vld [vmem:[%s345_s0] sm:$0xff]  ;;  %v34_v26 = vld [vmem:[%s347_s1 + $0x8] sm:$0xff] }
   0x7   :  { %v199_v20 = vld [vmem:[%s346_s2] ss:$0 sm:$0xff]  ;;  %v35_v24 = vld [vmem:[%s347_s1 + $0x10] sm:$0xff]  ;;  %v36_v28 = vld [vmem:[%s347_s1 + $0x18] sm:$0xff] }
   0x8   :  { %v30_v21 = vmul.f32 %v199_v20, %v22_v19  ;;  %v33_v25 = vld [vmem:[%s347_s1] sm:$0xff]  ;;  %v38_v36 = vld [vmem:[%s347_s1 + $0x28] sm:$0xff]  ;;  %v40_v43 = vld [vmem:[%s347_s1 + $0x38] sm:$0xff] }
   0x9   :  { %v200_v18 = vld [vmem:[#allocation2] ss:$0 sm:$0xff]  ;;  %v39_v45 = vld [vmem:[%s347_s1 + $0x30] sm:$0xff]  ;;  %v42_v54 = vld [vmem:[%s347_s1 + $0x48] sm:$0xff] }
   0xa   :  { %92 = vperm.xlu1 %203, %v54_v6   ;;  %87 = vperm.xlu0 %202, %v53_v7   ;;  %v37_v38 = vld [vmem:[%s347_s1 + $0x20] sm:$0xff]  ;;  %v43_v61 = vld [vmem:[%s347_s1 + $0x50] sm:$0xff]  ;;  %v44_v63 = vld [vmem:[%s347_s1 + $0x58] sm:$0xff] }
   0xb   :  { %v41_v52 = vld [vmem:[%s347_s1 + $0x40] sm:$0xff]  ;;  %v46_v7 = vld [vmem:[%s347_s1 + $0x68] sm:$0xff] }
   0xc   :  { %v45_v5 = vld [vmem:[%s347_s1 + $0x60] sm:$0xff] }
   0xe   :  { %102 = vperm.xlu1 %203, %v56_v8   ;;  %97 = vperm.xlu0 %202, %v55_v9  }
  0x12   :  { %112 = vperm.xlu1 %203, %v58_v10   ;;  %107 = vperm.xlu0 %202, %v57_v11  }
  0x16   :  { %122 = vperm.xlu1 %203, %v60_v12   ;;  %117 = vperm.xlu0 %202, %v59_v13   ;;  %v47_v13 = vld [vmem:[%s347_s1 + $0x70] sm:$0xff] }
  0x1a   :  { %132 = vperm.xlu1 %203, %v62_v14   ;;  %127 = vperm.xlu0 %202, %v61_v15  }
  0x1e   :  { %142 = vperm.xlu1 %203, %v64_v16   ;;  %137 = vperm.xlu0 %202, %v63_v17   ;;  %v48_v17 = vld [vmem:[%s347_s1 + $0x78] sm:$0xff] }
  0x22   :  { %190 = vperm.xlu1 %203, %v200_v18  }
  0x3d   :  { %31 = vadd.xlane.f32.xlu0 %v30_v21 }
  0x81   :  { %v78_v22 = vpop.permute.xlu1 %77  ;;  %v68_v23 = vpop.permute.xlu0 %67 }
  0x82   :  { %v147_v30 = vmul.f32 %v78_v22, %v35_v24  ;;  %v145_v31 = vmul.f32 %v68_v23, %v33_v25 }
  0x85   :  { %v83_v27 = vpop.permute.xlu1 %82  ;;  %v73_v29 = vpop.permute.xlu0 %72 }
  0x86   :  { %v146_v32 = vmul.f32 %v73_v29, %v34_v26  ;;  %v148_v33 = vmul.f32 %v83_v27, %v36_v28 }
  0x88   :  { %v161_v34 = vadd.f32 %v146_v32, %v145_v31 }
  0x89   :  { %v93_v35 = vpop.permute.xlu1 %92  ;;  %v88_v37 = vpop.permute.xlu0 %87 }
  0x8a   :  { %v162_v39 = vadd.f32 %v161_v34, %v147_v30  ;;  %v150_v40 = vmul.f32 %v93_v35, %v38_v36  ;;  %v149_v41 = vmul.f32 %v88_v37, %v37_v38 }
  0x8c   :  { %v163_v42 = vadd.f32 %v162_v39, %v148_v33 }
  0x8d   :  { %v98_v44 = vpop.permute.xlu0 %97  ;;  %v103_v47 = vpop.permute.xlu1 %102 }
  0x8e   :  { %v164_v46 = vadd.f32 %v163_v42, %v149_v41  ;;  %v152_v48 = vmul.f32 %v103_v47, %v40_v43  ;;  %v151_v49 = vmul.f32 %v98_v44, %v39_v45 }
  0x90   :  { %v165_v50 = vadd.f32 %v164_v46, %v150_v40 }
  0x91   :  { %v108_v51 = vpop.permute.xlu0 %107  ;;  %v113_v55 = vpop.permute.xlu1 %112 }
  0x92   :  { %v166_v53 = vadd.f32 %v165_v50, %v151_v49  ;;  %v153_v56 = vmul.f32 %v108_v51, %v41_v52  ;;  %v154_v58 = vmul.f32 %v113_v55, %v42_v54 }
  0x94   :  { %v167_v57 = vadd.f32 %v166_v53, %v152_v48 }
  0x95   :  { %v118_v60 = vpop.permute.xlu0 %117  ;;  %v123_v1 = vpop.permute.xlu1 %122 }
  0x96   :  { %v168_v59 = vadd.f32 %v167_v57, %v153_v56  ;;  %v155_v0 = vmul.f32 %v118_v60, %v43_v61  ;;  %v156_v2 = vmul.f32 %v123_v1, %v44_v63 }
  0x98   :  { %v169_v62 = vadd.f32 %v168_v59, %v154_v58 }
  0x99   :  { %v128_v4 = vpop.permute.xlu0 %127  ;;  %v133_v9 = vpop.permute.xlu1 %132 }
  0x9a   :  { %v170_v3 = vadd.f32 %v169_v62, %v155_v0  ;;  %v157_v8 = vmul.f32 %v128_v4, %v45_v5  ;;  %v158_v10 = vmul.f32 %v133_v9, %v46_v7 }
  0x9c   :  { %v171_v6 = vadd.f32 %v170_v3, %v156_v2 }
  0x9d   :  { %v138_v12 = vpop.permute.xlu0 %137  ;;  %v143_v16 = vpop.permute.xlu1 %142 }
  0x9e   :  { %v172_v11 = vadd.f32 %v171_v6, %v157_v8  ;;  %v159_v15 = vmul.f32 %v138_v12, %v47_v13  ;;  %v160_v19 = vmul.f32 %v143_v16, %v48_v17 }
  0xa0   :  { %v173_v14 = vadd.f32 %v172_v11, %v158_v10 }
  0xa1   :  { %v191_v29 = vpop.permute.xlu1 %190 }
  0xa2   :  { %v174_v18 = vadd.f32 %v173_v14, %v159_v15 }
  0xa4   :  { %v175_v20 = vadd.f32 %v174_v18, %v160_v19 }
  0xa6   :  { %v176_v21 = vrot.slane %v175_v20, 4 }
  0xa8   :  { %v177_v22 = vadd.f32 %v176_v21, %v175_v20 }
  0xaa   :  { %v178_v23 = vrot.slane %v177_v22, 2 }
  0xac   :  { %v179_v24 = vadd.f32 %v178_v23, %v177_v22 }
  0xae   :  { %v180_v25 = vrot.slane %v179_v24, 1 }
  0xb0   :  { %v181_v26 = vadd.f32 %v180_v25, %v179_v24 }
  0xca   :  { %v32_v27 = vpop.xlane.xlu0 %31 }
  0xcb   :  { %v182_v28 = vadd.f32 %v181_v26, %v32_v27 }
  0xcd   :  { %v193_v30 = vadd.f32 %v191_v29, %v182_v28 }
  0xcf   :  { %194 = vst [vmem:[%s348_s5] sm:$0xff] %v193_v30 }

</bundles_post_ra>
